<compile_context>
chip_gen: v5e
topology: v5e:2x2
jax: 0.10.0
libtpu: 0.0.40
codegen_flags: <defaults>
</compile_context>

<pallas_src>
import functools

import jax
import jax.numpy as jnp
from jax.experimental import pallas as pl
from jax.experimental.pallas import tpu as pltpu


_SMALL_SHAPE_FLOPS = 1_000_000  # below this, plain XLA fusion beats pallas_call overhead


def _round_up(x, m):
    return ((x + m - 1) // m) * m


def _vmem_cap_bytes():
    """Generation-aware VMEM ceiling with ~25% headroom (v7x has only 64 MiB/TC)."""
    try:
        cap = int(pltpu.get_tpu_info().vmem_capacity_bytes)
    except Exception:
        cap = 64 * 1024 * 1024  # conservative fallback: valid on every generation
    return int(cap * 0.75)


def _pick_tiles(M, K, N):
    """Padding-aware, generation-friendly tiles.

    Returns (tm, tn, tk, Mp, Np, Kp)."""
    # --- M: cover the whole batch with one sublane-aligned tile when it fits.
    tm = _round_up(min(M, 512), 8)
    Mp = _round_up(M, tm)
    gm = Mp // tm

    # --- K: single full-reduction block for K <= 2048 (no padding, weight read
    # exactly once); otherwise 1024-wide blocks with zero-padded tail.
    if K <= 2048:
        tk, Kp = K, K
    else:
        tk = 1024
        Kp = _round_up(K, tk)

    # --- N: pad only to the next multiple of 128; tn is the largest
    # 128-multiple divisor of Np (lane-dense, unmasked vst).
    Np = _round_up(N, 128)
    cands = [t for t in (Np if Np <= 1024 else 0, 512, 384, 256, 128)
             if 0 < t <= Np and Np % t == 0 and t % 128 == 0]
    cands = sorted(set(cands), reverse=True)
    tn = cands[0]
    # Keep >= 2 blocks along a "parallel" axis when the M grid collapsed,
    # so both v7x TensorCores get work (no effect on single-TC v5e/v6e).
    if gm == 1 and Np // tn == 1 and Np > 128:
        for t in cands:
            if Np // t >= 2:
                tn = t
                break
    return tm, tn, tk, Mp, Np, Kp


def _fc_relu_single_k_kernel(x_ref, w_ref, b_ref, o_ref):
    # Whole reduction in one block: no accumulator scratch, write result directly.
    acc = jnp.dot(x_ref[...], w_ref[...], preferred_element_type=jnp.float32)
    acc = acc + b_ref[...].astype(jnp.float32)          # (1, tn) broadcasts over rows
    o_ref[...] = jnp.maximum(acc, 0.0).astype(o_ref.dtype)


def _fc_relu_multi_k_kernel(x_ref, w_ref, b_ref, o_ref, acc_ref):
    # x_ref: (tm, tk)   w_ref: (tk, tn)  (native MXU RHS layout)
    # b_ref: (1, tn)    o_ref: (tm, tn)  acc_ref: (tm, tn) f32 scratch
    k = pl.program_id(2)

    @pl.when(k == 0)
    def _init():
        # Fold bias into the accumulator init: removes a full-tile VPU add pass.
        acc_ref[...] = jnp.broadcast_to(
            b_ref[...].astype(jnp.float32), acc_ref.shape)

    acc_ref[...] += jnp.dot(x_ref[...], w_ref[...],
                            preferred_element_type=jnp.float32)

    @pl.when(k == pl.num_programs(2) - 1)
    def _finalize():
        o_ref[...] = jnp.maximum(acc_ref[...], 0.0).astype(o_ref.dtype)


@functools.partial(jax.jit, static_argnames=("force_pallas",))
def fully_connect_forward(x, weight, bias, *, force_pallas=False):
    """relu(x @ weight.T + bias) — weight arrives in PyTorch (OUT, IN) layout."""
    B, K = x.shape
    N = weight.shape[0]

    if not force_pallas and (B * K * N) < _SMALL_SHAPE_FLOPS:
        # Tiny layer: pallas_call launch / pad / slice dominate — let XLA fuse it.
        return jnp.maximum(x @ weight.T + bias, 0.0).astype(x.dtype)

    tm, tn, tk, Mp, Np, Kp = _pick_tiles(B, K, N)
    gm, gn, gk = Mp // tm, Np // tn, Kp // tk
    single_k = gk == 1

    # One-time transpose to the native MXU RHS layout (K on sublanes, N on lanes);
    # weight is static in real use so this amortizes, and the kernel needs no
    # per-tile XLU transpose ahead of the MXU push.
    wT = weight.T

    # Zero-padding keeps the math exact: padded K contributes 0 to the dot,
    # padded N columns get bias 0 -> relu(0) = 0 and are sliced off below.
    xp = x if (Mp == B and Kp == K) else jnp.pad(x, ((0, Mp - B), (0, Kp - K)))
    wp = wT if (Kp == K and Np == N) else jnp.pad(wT, ((0, Kp - K), (0, Np - N)))
    bp = bias if Np == N else jnp.pad(bias, (0, Np - N))
    b2d = bp.reshape(1, Np)

    itemsize = jnp.dtype(x.dtype).itemsize
    working = (2 * (tm * tk + tk * tn + tn) * itemsize   # double-buffered inputs
               + 2 * tm * tn * itemsize)                 # output tile
    if not single_k:
        working += tm * tn * 4                           # f32 accumulator
    vmem_limit = min(max(int(working * 2), 4 * 1024 * 1024), _vmem_cap_bytes())

    cost = pl.CostEstimate(
        flops=2 * Mp * Np * Kp,
        transcendentals=0,
        bytes_accessed=(xp.size + wp.size + b2d.size + Mp * Np) * itemsize)

    if single_k:
        grid = (gm, gn)
        in_specs = [
            pl.BlockSpec((tm, tk), lambda i, j: (i, 0)),   # x
            pl.BlockSpec((tk, tn), lambda i, j: (0, j)),   # weight (K, N)
            pl.BlockSpec((1, tn), lambda i, j: (0, j)),    # bias
        ]
        out_specs = pl.BlockSpec((tm, tn), lambda i, j: (i, j))
        scratch_shapes = ()
        kernel = _fc_relu_single_k_kernel
        dims = ("parallel", "parallel")
    else:
        grid = (gm, gn, gk)
        in_specs = [
            pl.BlockSpec((tm, tk), lambda i, j, k: (i, k)),  # x
            pl.BlockSpec((tk, tn), lambda i, j, k: (k, j)),  # weight (K, N)
            pl.BlockSpec((1, tn), lambda i, j, k: (0, j)),   # bias
        ]
        out_specs = pl.BlockSpec((tm, tn), lambda i, j, k: (i, j))
        scratch_shapes = (pltpu.VMEM((tm, tn), jnp.float32),)
        kernel = _fc_relu_multi_k_kernel
        dims = ("parallel", "parallel", "arbitrary")

    out = pl.pallas_call(
        kernel,
        out_shape=jax.ShapeDtypeStruct((Mp, Np), x.dtype),
        grid_spec=pltpu.PrefetchScalarGridSpec(
            num_scalar_prefetch=0,
            grid=grid,
            in_specs=in_specs,
            out_specs=out_specs,
            scratch_shapes=scratch_shapes,
        ),
        compiler_params=pltpu.CompilerParams(
            dimension_semantics=dims,
            vmem_limit_bytes=vmem_limit,
        ),
        cost_estimate=cost,
    )(xp, wp, b2d)

    return out[:B, :N]


def _ref(x, weight, bias):
    return jnp.maximum(x @ weight.T + bias, 0.0)


def _make_layer(key, in_u, out_u):
    kw, kb = jax.random.split(key)
    bound = 1.0 / jnp.sqrt(jnp.float32(in_u))
    w = jax.random.uniform(kw, (out_u, in_u), jnp.float32, minval=-bound, maxval=bound)
    b = jax.random.uniform(kb, (out_u,), jnp.float32, minval=-bound, maxval=bound)
    return w, b


if __name__ == "__main__":
    key = jax.random.PRNGKey(0)

    # --- shipped shapes: batch=8, INPUT_UNIT=32, OUTPUT_UNIT=64 ---------------
    # (forced through the Pallas path to exercise the single-K kernel)
    B, INPUT_UNIT, OUTPUT_UNIT = 8, 32, 64
    kx, kl, key = jax.random.split(key, 3)
    w1, b1 = _make_layer(kl, INPUT_UNIT, OUTPUT_UNIT)
    x1 = jax.random.normal(kx, (B, INPUT_UNIT), jnp.float32)

    out1 = fully_connect_forward(x1, w1, b1, force_pallas=True)
    jax.block_until_ready(out1)
    assert out1.shape == (B, OUTPUT_UNIT)
    assert jnp.allclose(out1, _ref(x1, w1, b1), atol=1e-5, rtol=1e-5)

    # --- non-128-aligned M/K/N: single full-K block, padded N only ------------
    B2, K2, N2 = 256, 640, 320
    kx2, kl2, key = jax.random.split(key, 3)
    w2, b2 = _make_layer(kl2, K2, N2)
    x2 = jax.random.normal(kx2, (B2, K2), jnp.float32)

    out2 = fully_connect_forward(x2, w2, b2)
    jax.block_until_ready(out2)
    assert out2.shape == (B2, N2)
    assert jnp.allclose(out2, _ref(x2, w2, b2), atol=1e-3, rtol=1e-3)

    # --- large K: exercises the multi-K accumulator path (K padded to tk) -----
    B3, K3, N3 = 64, 2304, 256
    kx3, kl3, key = jax.random.split(key, 3)
    w3, b3 = _make_layer(kl3, K3, N3)
    x3 = jax.random.normal(kx3, (B3, K3), jnp.float32)

    out3 = fully_connect_forward(x3, w3, b3)
    jax.block_until_ready(out3)
    assert out3.shape == (B3, N3)
    assert jnp.allclose(out3, _ref(x3, w3, b3), atol=2e-3, rtol=2e-3)

    print("KERNEL_OK")
</pallas_src>

<mosaic_0001>
module attributes {stable_mosaic.version = 11 : i64} {
  func.func @_fc_relu_single_k_kernel(%arg0: i32, %arg1: i32, %arg2: memref<8x32xf32, #tpu.memory_space<vmem>>, %arg3: memref<32x128xf32, #tpu.memory_space<vmem>>, %arg4: memref<1x128xf32, #tpu.memory_space<vmem>>, %arg5: memref<8x128xf32, #tpu.memory_space<vmem>>) attributes {dimension_semantics = [#tpu.dimension_semantics<parallel>, #tpu.dimension_semantics<parallel>], iteration_bounds = array<i64: 1, 1>, scalar_prefetch = 0 : i64, scratch_operands = 0 : i64, tpu.core_type = #tpu.core_type<tc>, window_params = [{transform_indices = @transform_0, window_bounds = array<i64: 8, 32>}, {transform_indices = @transform_1, window_bounds = array<i64: 32, 128>}, {transform_indices = @transform_2, window_bounds = array<i64: 1, 128>}, {transform_indices = @transform_3, window_bounds = array<i64: 8, 128>}]} {
    %c0 = arith.constant 0 : index
    %c0_0 = arith.constant 0 : index
    %0 = vector.load %arg2[%c0, %c0_0] : memref<8x32xf32, #tpu.memory_space<vmem>>, vector<8x32xf32>
    %c0_1 = arith.constant 0 : index
    %c0_2 = arith.constant 0 : index
    %1 = vector.load %arg3[%c0_1, %c0_2] : memref<32x128xf32, #tpu.memory_space<vmem>>, vector<32x128xf32>
    %cst = arith.constant dense<0.000000e+00> : vector<8x128xf32>
    %2 = tpu.matmul %0, %1, %cst {dimension_numbers = #tpu.dot_dimension_numbers<[1], [0], [0], [1], [0, 0, 1, 1], [], []>} : vector<8x32xf32>, vector<32x128xf32>, vector<8x128xf32> -> vector<8x128xf32>
    %c0_3 = arith.constant 0 : index
    %c0_4 = arith.constant 0 : index
    %3 = vector.load %arg4[%c0_3, %c0_4] : memref<1x128xf32, #tpu.memory_space<vmem>>, vector<1x128xf32>
    %4 = vector.broadcast %3 : vector<1x128xf32> to vector<8x128xf32>
    %5 = arith.addf %2, %4 : vector<8x128xf32>
    %cst_5 = arith.constant 0.000000e+00 : f32
    %6 = vector.broadcast %cst_5 : f32 to vector<8x128xf32>
    %7 = arith.maximumf %5, %6 : vector<8x128xf32>
    %c0_6 = arith.constant 0 : index
    %c0_7 = arith.constant 0 : index
    %8 = vector.load %arg5[%c0_6, %c0_7] : memref<8x128xf32, #tpu.memory_space<vmem>>, vector<8x128xf32>
    tpu.vector_store %arg5[%c0_6, %c0_7], %7 {strides = array<i32>} : memref<8x128xf32, #tpu.memory_space<vmem>>, vector<8x128xf32>,
    return
  }
  func.func @transform_0(%arg0: i32, %arg1: i32) -> (i32, i32) {
    %c0_i32 = arith.constant 0 : i32
    %c0_i32_0 = arith.constant 0 : i32
    return %arg0, %c0_i32 : i32, i32
  }
  func.func @transform_1(%arg0: i32, %arg1: i32) -> (i32, i32) {
    %c0_i32 = arith.constant 0 : i32
    %c0_i32_0 = arith.constant 0 : i32
    return %c0_i32, %arg1 : i32, i32
  }
  func.func @transform_2(%arg0: i32, %arg1: i32) -> (i32, i32) {
    %c0_i32 = arith.constant 0 : i32
    %c0_i32_0 = arith.constant 0 : i32
    return %c0_i32, %arg1 : i32, i32
  }
  func.func @transform_3(%arg0: i32, %arg1: i32) -> (i32, i32) {
    %c0_i32 = arith.constant 0 : i32
    return %arg0, %arg1 : i32, i32
  }
}

</mosaic_0001>

<bundles_post_ra>
// kernel: fully_connect_forward.1
= control target key start
LH: loop header
LB: loop body
LE: loop exit
PB: predicated region body
PF: predicated region fallthrough
CT: control target
= control target key end

     0   :  { %s137_s0 = inlined_call_operand.vmem [shape: f32[8,32], index: 0, kind: input, shape index: {}]   ;;  %s138_s1 = inlined_call_operand.vmem [shape: f32[32,128], index: 1, kind: input, shape index: {}]   ;;  %s139_s2 = inlined_call_operand.vmem [shape: f32[1,128], index: 2, kind: input, shape index: {}]   ;;  %s140_s3 = inlined_call_operand.hbm [shape: f32[8,128], index: 3, kind: output, shape index: {}]  }
   0x1   :  { %v19_v0 = vld [vmem:[%s138_s1 + $0x18] sm:$0xff]  ;;  %v18_v1 = vld [vmem:[%s138_s1 + $0x10] sm:$0xff]  ;;  %v17_v2 = vld [vmem:[%s138_s1 + $0x8] sm:$0xff] }
   0x2   :  { %40 = vmatpush.msra.mxu0 %v19_v0 }
   0x3   :  { %8 = vsyncpa [#allocation3], 0  ;;  %v16_v3 = vld [vmem:[%s138_s1] sm:$0xff]  ;;  %vm24_vm0 = vcmask 261120   ;;  %s95_s24 = smov [#allocation2]   ;;  %s57_s28 = sshll.u32 %s140_s3, 4  ;;  %s58_s28 = int_to_ptr.hbm [resolvable:$true] %s57_s28 }
   0x4   :  { %41 = vmatpush.msra.mxu0 %v18_v1  ;;  %v15_v4 = vld [vmem:[%s137_s0] sm:$0xff]  ;;  %s55_s25 = sshll.u32 %s95_s24, 4  ;;  %s56_s25 = int_to_ptr.vmem [resolvable:$true] %s55_s25 }
   0x5   :  { %v68_v5 = vld [vmem:[%s139_s2] ss:$0 sm:$0xff] }
   0x6   :  { %42 = vmatpush.msra.mxu0 %v17_v2 }
   0x8   :  { %43 = vmatpush.msra.mxu0 %v16_v3 }
   0x9   :  { %66 = vmatmul.msk.f32.vlgmr.msra.gmra.mxu0 %vm24_vm0, %v15_v4 }
  0x86   :  { %v45_v6 = vpop.f32.mrf.mxu0 }
  0x87   :  { %v46_v7 = vadd.f32 %v68_v5, %v45_v6 }
  0x89   :  { %v48_v8 = vmax.f32 %v46_v7, 0.0 }
  0x8b   :  { %49 = vst [vmem:[#allocation2] sm:$0xff] %v48_v8 }
  0x8c   :  { %60 = dma.vmem_to_hbm [thread:$0]  %s56_s25, 128, %s58_s28, [#allocation3]  }
  0x8d   :  { %93 = dma.done.wait [#allocation3], 128  }
  0x8e   :  { %94 = vsyncadd [#allocation3], 4294967168 }
  0x8f   :  { %65 = vsyncpa [#allocation3], 1 }

</bundles_post_ra>
